<compile_context>
chip_gen: v5e
topology: v5e:2x2
jax: 0.10.0
libtpu: 0.0.40
codegen_flags: <defaults>
</compile_context>

<pallas_src>
import jax
import jax.numpy as jnp
from jax import lax
from jax.experimental import pallas as pl
from jax.experimental.pallas import tpu as pltpu


def _round_up(x, m):
    return ((x + m - 1) // m) * m


# ----------------------------- kernels --------------------------------------


def _linear_kernel_2d(x_ref, w_ref, o_ref):
    # Whole K contraction fits one tile: grid is (M, N) only -> no accumulator,
    # no pl.when, no scratch copy.
    o_ref[...] = lax.dot_general(
        x_ref[...],
        w_ref[...],
        dimension_numbers=(((1,), (1,)), ((), ())),  # contract minor dims (trans-B)
        preferred_element_type=jnp.float32,
    ).astype(o_ref.dtype)


def _linear_kernel_3d_f32out(x_ref, w_ref, o_ref):
    # f32 output: accumulate directly into the k-resident output block
    # (output block index is constant across the 'arbitrary' k axis).
    @pl.when(pl.program_id(2) == 0)
    def _():
        o_ref[...] = jnp.zeros_like(o_ref)

    o_ref[...] += lax.dot_general(
        x_ref[...],
        w_ref[...],
        dimension_numbers=(((1,), (1,)), ((), ())),
        preferred_element_type=jnp.float32,
    )


def _linear_kernel_3d_acc(x_ref, w_ref, o_ref, acc_ref):
    # Narrow (e.g. bf16) output: keep an f32 VMEM accumulator, cast once at the end.
    @pl.when(pl.program_id(2) == 0)
    def _():
        acc_ref[...] = jnp.zeros_like(acc_ref)

    acc_ref[...] += lax.dot_general(
        x_ref[...],
        w_ref[...],
        dimension_numbers=(((1,), (1,)), ((), ())),
        preferred_element_type=jnp.float32,
    )

    @pl.when(pl.program_id(2) == pl.num_programs(2) - 1)
    def _():
        o_ref[...] = acc_ref[...].astype(o_ref.dtype)


# ----------------------------- wrapper ---------------------------------------


def single_layer_forward(x, weight, *, tm=None, tn=None, tk=None):
    """Forward of SingleLayerNeuralNetwork: nn.Linear(input_dim, output_dim, bias=False).

    x:      (batch, input_dim)
    weight: (output_dim, input_dim)   -- PyTorch convention, NOT transposed here
    returns (batch, output_dim), dtype of x
    """
    batch, input_dim = x.shape
    output_dim, in_dim_w = weight.shape
    assert in_dim_w == input_dim, "weight must be (output_dim, input_dim)"

    itemsize = jnp.dtype(x.dtype).itemsize
    out_dtype = x.dtype

    # Default tile budget (~11 MiB double-buffered): big enough to approach the
    # HBM roofline, small enough for v7x's 64 MiB (32 MiB scoped) VMEM.
    if tm is None:
        tm = 512
    if tn is None:
        tn = 512
    if tk is None:
        tk = 1024 if itemsize >= 4 else 2048  # bf16: double K, same bytes/tile

    # Sublane alignment: 8 for 4-byte dtypes, 16 for bf16, 32 for int8/fp8.
    sub_align = max(8, 32 // itemsize)

    def _pick(dim, max_tile, align):
        # Full-extent block if the dim fits in one tile (no padding, no alignment
        # requirement); otherwise an aligned tile + pad the dim to a multiple.
        if dim <= max_tile:
            return dim, dim
        tile = max(align, (max_tile // align) * align)
        return tile, _round_up(dim, tile)

    tm, m_pad = _pick(batch, tm, sub_align)
    tn, n_pad = _pick(output_dim, tn, max(128, sub_align))  # lane dim of out / sublane of W
    tk, k_pad = _pick(input_dim, tk, 128)

    # Pad only the over-tile, unaligned dims (zero K-padding keeps the dot exact).
    if (m_pad, k_pad) != (batch, input_dim):
        x = jnp.pad(x, ((0, m_pad - batch), (0, k_pad - input_dim)))
    if (n_pad, k_pad) != (output_dim, input_dim):
        weight = jnp.pad(weight, ((0, n_pad - output_dim), (0, k_pad - input_dim)))

    m_blocks, n_blocks, k_blocks = m_pad // tm, n_pad // tn, k_pad // tk

    cost = pl.CostEstimate(
        flops=2 * m_pad * n_pad * k_pad,
        transcendentals=0,
        bytes_accessed=(m_pad * k_pad + n_pad * k_pad) * itemsize
        + m_pad * n_pad * jnp.dtype(out_dtype).itemsize,
    )

    # Explicit VMEM limit: above v5e's 16 MiB scoped default, never above v7x's
    # 64 MiB physical.
    vmem_need = (2 * tm * tk + 2 * tn * tk) * itemsize + 3 * tm * tn * 4
    vmem_limit = int(min(max(vmem_need + (8 << 20), 32 << 20), 48 << 20))

    if k_blocks == 1:
        # Reduction axis collapsed: 2-D grid, both axes megacore-parallel on v7x.
        out_pad = pl.pallas_call(
            _linear_kernel_2d,
            out_shape=jax.ShapeDtypeStruct((m_pad, n_pad), out_dtype),
            grid=(m_blocks, n_blocks),
            in_specs=[
                pl.BlockSpec((tm, tk), lambda i, j: (i, 0)),  # x tile
                pl.BlockSpec((tn, tk), lambda i, j: (j, 0)),  # W tile (PyTorch layout)
            ],
            out_specs=pl.BlockSpec((tm, tn), lambda i, j: (i, j)),
            compiler_params=pltpu.CompilerParams(
                dimension_semantics=("parallel", "parallel"),
                vmem_limit_bytes=vmem_limit,
            ),
            cost_estimate=cost,
        )(x, weight)
    else:
        x_spec = pl.BlockSpec((tm, tk), lambda i, j, k: (i, k))
        w_spec = pl.BlockSpec((tn, tk), lambda i, j, k: (j, k))
        o_spec = pl.BlockSpec((tm, tn), lambda i, j, k: (i, j))
        params = pltpu.CompilerParams(
            dimension_semantics=("parallel", "parallel", "arbitrary"),
            vmem_limit_bytes=vmem_limit,
        )
        if jnp.dtype(out_dtype) == jnp.dtype(jnp.float32):
            out_pad = pl.pallas_call(
                _linear_kernel_3d_f32out,
                out_shape=jax.ShapeDtypeStruct((m_pad, n_pad), out_dtype),
                grid=(m_blocks, n_blocks, k_blocks),
                in_specs=[x_spec, w_spec],
                out_specs=o_spec,
                compiler_params=params,
                cost_estimate=cost,
            )(x, weight)
        else:
            out_pad = pl.pallas_call(
                _linear_kernel_3d_acc,
                out_shape=jax.ShapeDtypeStruct((m_pad, n_pad), out_dtype),
                grid=(m_blocks, n_blocks, k_blocks),
                in_specs=[x_spec, w_spec],
                out_specs=o_spec,
                scratch_shapes=[pltpu.VMEM((tm, tn), jnp.float32)],
                compiler_params=params,
                cost_estimate=cost,
            )(x, weight)

    if (m_pad, n_pad) != (batch, output_dim):
        out_pad = out_pad[:batch, :output_dim]
    return out_pad


# ------------------------------- test ----------------------------------------

if __name__ == "__main__":
    # TODO(synk): the pandas CSV load in the original script is host-side data prep,
    # not part of the module's forward; deterministic synthetic inputs are used here.
    key = jax.random.PRNGKey(0)

    # 1) Small shapes matching the module (f32, single-tile fast path: 2-D grid).
    batch, input_dim, output_dim = 8, 32, 16
    kx, kw, kx2, kw2 = jax.random.split(key, 4)
    x = jax.random.normal(kx, (batch, input_dim), dtype=jnp.float32)
    bound = 1.0 / (input_dim ** 0.5)  # PyTorch nn.Linear default init range
    w = jax.random.uniform(
        kw, (output_dim, input_dim), minval=-bound, maxval=bound, dtype=jnp.float32
    )
    out = jax.block_until_ready(single_layer_forward(x, w))
    ref = x @ w.T
    assert out.shape == (batch, output_dim)
    assert jnp.allclose(out, ref, atol=1e-5, rtol=1e-5)

    # 2) Tiled 3-D path (f32 accumulate-into-output), tiny tiles to force a (2,2,3) grid.
    b2, k2, n2 = 16, 384, 256
    x2 = jax.random.normal(kx2, (b2, k2), dtype=jnp.float32)
    w2 = jax.random.uniform(
        kw2, (n2, k2), minval=-1.0 / (k2 ** 0.5), maxval=1.0 / (k2 ** 0.5), dtype=jnp.float32
    )
    out2 = jax.block_until_ready(single_layer_forward(x2, w2, tm=8, tn=128, tk=128))
    assert jnp.allclose(out2, x2 @ w2.T, atol=1e-4, rtol=1e-4)

    # 3) bf16 inputs (MXU-native dtype), f32-scratch accumulator path, (1,2,3) grid.
    x3 = x2.astype(jnp.bfloat16)
    w3 = w2.astype(jnp.bfloat16)
    out3 = jax.block_until_ready(single_layer_forward(x3, w3, tm=16, tn=128, tk=128))
    ref3 = (x3.astype(jnp.float32) @ w3.astype(jnp.float32).T)
    assert jnp.allclose(out3.astype(jnp.float32), ref3, atol=2e-2, rtol=2e-2)

    print("KERNEL_OK")
</pallas_src>

<mosaic_0001>
module attributes {stable_mosaic.version = 11 : i64} {
  func.func @_linear_kernel_2d(%arg0: i32, %arg1: i32, %arg2: memref<8x32xf32, #tpu.memory_space<vmem>>, %arg3: memref<16x32xf32, #tpu.memory_space<vmem>>, %arg4: memref<8x16xf32, #tpu.memory_space<vmem>>) attributes {dimension_semantics = [#tpu.dimension_semantics<parallel>, #tpu.dimension_semantics<parallel>], iteration_bounds = array<i64: 1, 1>, scalar_prefetch = 0 : i64, scratch_operands = 0 : i64, tpu.core_type = #tpu.core_type<tc>, window_params = [{transform_indices = @transform_0, window_bounds = array<i64: 8, 32>}, {transform_indices = @transform_1, window_bounds = array<i64: 16, 32>}, {transform_indices = @transform_2, window_bounds = array<i64: 8, 16>}]} {
    %c0 = arith.constant 0 : index
    %c0_0 = arith.constant 0 : index
    %0 = vector.load %arg2[%c0, %c0_0] : memref<8x32xf32, #tpu.memory_space<vmem>>, vector<8x32xf32>
    %c0_1 = arith.constant 0 : index
    %c0_2 = arith.constant 0 : index
    %1 = vector.load %arg3[%c0_1, %c0_2] : memref<16x32xf32, #tpu.memory_space<vmem>>, vector<16x32xf32>
    %cst = arith.constant dense<0.000000e+00> : vector<8x16xf32>
    %2 = tpu.matmul %0, %1, %cst {dimension_numbers = #tpu.dot_dimension_numbers<[1], [1], [0], [0], [0, 0, 1, 0], [], []>} : vector<8x32xf32>, vector<16x32xf32>, vector<8x16xf32> -> vector<8x16xf32>
    %c0_3 = arith.constant 0 : index
    %c0_4 = arith.constant 0 : index
    %3 = vector.load %arg4[%c0_3, %c0_4] : memref<8x16xf32, #tpu.memory_space<vmem>>, vector<8x16xf32>
    tpu.vector_store %arg4[%c0_3, %c0_4], %2 {strides = array<i32>} : memref<8x16xf32, #tpu.memory_space<vmem>>, vector<8x16xf32>,
    return
  }
  func.func @transform_0(%arg0: i32, %arg1: i32) -> (i32, i32) {
    %c0_i32 = arith.constant 0 : i32
    %c0_i32_0 = arith.constant 0 : i32
    return %arg0, %c0_i32 : i32, i32
  }
  func.func @transform_1(%arg0: i32, %arg1: i32) -> (i32, i32) {
    %c0_i32 = arith.constant 0 : i32
    %c0_i32_0 = arith.constant 0 : i32
    return %arg1, %c0_i32 : i32, i32
  }
  func.func @transform_2(%arg0: i32, %arg1: i32) -> (i32, i32) {
    %c0_i32 = arith.constant 0 : i32
    return %arg0, %arg1 : i32, i32
  }
}

</mosaic_0001>

<bundles_post_ra>
// kernel: tpu_custom_call.1
= control target key start
LH: loop header
LB: loop body
LE: loop exit
PB: predicated region body
PF: predicated region fallthrough
CT: control target
= control target key end

     0   :  { %7 = vsyncpa [#allocation3], 0  ;;  %s210_s0 = inlined_call_operand.hbm [shape: f32[8,32], index: 0, kind: input, shape index: {}]   ;;  %s211_s1 = inlined_call_operand.hbm [shape: f32[16,32], index: 1, kind: input, shape index: {}]   ;;  %s212_s2 = inlined_call_operand.hbm [shape: f32[8,16], index: 2, kind: output, shape index: {}]  }
   0x1   :  { %8 = vsyncpa [#allocation6], 0 }
   0x2   :  { %9 = vsyncpa [#allocation4], 0  ;;  %s15_s11 = sshll.u32 %s210_s0, 4  ;;  %s181_s12 = smov [#allocation2]   ;;  %s16_s11 = int_to_ptr.hbm [resolvable:$true] %s15_s11 }
   0x3   :  { %s17_s13 = sshll.u32 %s181_s12, 4  ;;  %s25_s16 = sshll.u32 %s211_s1, 4  ;;  %s18_s13 = int_to_ptr.vmem [resolvable:$true] %s17_s13  ;;  %s26_s16 = int_to_ptr.hbm [resolvable:$true] %s25_s16 }
   0x4   :  { %20 = dma.hbm_to_vmem [thread:$0]  %s16_s11, 128, %s18_s13, [#allocation3]  }
   0x5   :  { %s182_s17 = smov [#allocation5]   ;;  %s183_s19 = smov 128  }
   0x6   :  { %s27_s18 = sshll.u32 %s182_s17, 4  ;;  %s184_s20 = smov 8   ;;  %s28_s18 = int_to_ptr.vmem [resolvable:$true] %s27_s18 }
   0x7   :  { %33 = dma.hbm_to_vmem [thread:$0]  %s26_s16, 256, %s28_s18, [#allocation6], %s183_s19, %s183_s19, %s184_s20  }
   0x8   :  { %175 = dma.done.wait [#allocation3], 128  }
   0x9   :  { %176 = vsyncadd [#allocation3], 4294967168 }
   0xa   :  { %177 = dma.done.wait [#allocation6], 256  }
   0xb   :  { %178 = vsyncadd [#allocation6], 4294967040  ;;  %vm45_vm0 = vcmask 261120   ;;  %v44_v0 = vld [vmem:[#allocation5 + $0x8] sm:$0xff]  ;;  %v43_v1 = vld [vmem:[#allocation5] sm:$0xff]  ;;  %s185_s0 = smov [#allocation7]  }
   0xc   :  { %95 = vmatpush.xpose.msk.msra.mxu0 %vm45_vm0, %v44_v0  ;;  %v42_v2 = vld [vmem:[#allocation2] sm:$0xff]  ;;  %s82_s1 = sshll.u32 %s185_s0, 4  ;;  %s84_s23 = sshll.u32 %s212_s2, 4  ;;  %vm75_vm1 = vcmask 130048   ;;  %s83_s1 = int_to_ptr.vmem [resolvable:$true] %s82_s1  ;;  %s85_s23 = int_to_ptr.hbm [resolvable:$true] %s84_s23 }
  0x10   :  { %96 = vmatpush.xpose.msk.msra.mxu0 %vm45_vm0, %v43_v1 }
  0x13   :  { %97 = vmatmul.msk.f32.vlgmr.msra.gmra.mxu0 %vm45_vm0, %v42_v2 }
  0x90   :  { %v72_v3 = vpop.f32.mrf.mxu0 }
  0x91   :  { %76 = vst.msk [vmem:[#allocation7] sm:$0xff] %vm75_vm1, %v72_v3 }
  0x92   :  { %87 = dma.vmem_to_hbm [thread:$0]  %s83_s1, 128, %s85_s23, [#allocation4]  }
  0x93   :  { %179 = dma.done.wait [#allocation4], 128  }
  0x94   :  { %180 = vsyncadd [#allocation4], 4294967168 }
  0x95   :  { %92 = vsyncpa [#allocation3], 1 }
  0x96   :  { %93 = vsyncpa [#allocation6], 1 }
  0x97   :  { %94 = vsyncpa [#allocation4], 1 }

</bundles_post_ra>
